<compile_context>
chip_gen: v7x
topology: tpu7x:2x2x1
jax: 0.10.0
libtpu: 0.0.40
codegen_flags: <defaults>
</compile_context>

<pallas_src>
import functools

import jax
import jax.numpy as jnp
from jax.experimental import pallas as pl
from jax.experimental.pallas import tpu as pltpu

_LOG_2PI = 1.8378770664093453  # log(2*pi)


# --------------------------------------------------------------------------
# Kernels
# --------------------------------------------------------------------------
def _score_kernel(z_ref, x_ref, w_ref, b_ref, inv_s2_ref, part_ref):
    """Per-batch-tile data-dependent part of log p(x, z).

    partial = -0.5 * ( inv_sigma2 * ||x - (zW + b)||^2 + ||z||^2 )
    (all data-independent constants are added in the wrapper).
    """
    z = z_ref[...]                                   # [TB, Dz] f32
    x = x_ref[...]                                   # [TB, Dx] f32
    inv_sigma2 = inv_s2_ref[0, 0]                    # SMEM scalar (precomputed)

    # MXU matmul: bf16 operands, f32 accumulation; bias add in f32.
    mean = jnp.dot(z.astype(jnp.bfloat16), w_ref[...],
                   preferred_element_type=jnp.float32) + b_ref[...]

    resid = x - mean                                 # f32 VPU math
    partial = -0.5 * (inv_sigma2 * jnp.sum(resid * resid) + jnp.sum(z * z))

    # Lane-dense (1,1,128) store (avoids a masked single-lane vst).
    part_ref[...] = jnp.broadcast_to(partial, part_ref.shape).astype(jnp.float32)


def _sample_kernel(z_ref, eps_ref, w_ref, b_ref, sigma_ref, x_ref):
    """Fused sampling: x = (z @ W + b) + sigma * eps (no mean HBM round trip)."""
    mean = jnp.dot(z_ref[...].astype(jnp.bfloat16), w_ref[...],
                   preferred_element_type=jnp.float32) + b_ref[...]
    x_ref[...] = mean + sigma_ref[0, 0] * eps_ref[...]


# --------------------------------------------------------------------------
# Wrappers
# --------------------------------------------------------------------------
def _compiler_params():
    return pltpu.CompilerParams(
        dimension_semantics=("parallel",),        # batch tiles are independent
        vmem_limit_bytes=32 * 1024 * 1024,        # safe on v5e/v6e/v7x
    )


@functools.partial(jax.jit, static_argnames=("tb",))
def _score_call(z, x, w, b, log_sigma, *, tb):
    bsz, dz = z.shape
    dx = x.shape[1]
    assert bsz % tb == 0, "batch must be divisible by the batch tile"
    nt = bsz // tb

    w_bf16 = w.astype(jnp.bfloat16)               # halves W HBM bytes, MXU-native
    inv_sigma2 = jnp.reshape(jnp.exp(-2.0 * log_sigma), (1, 1)).astype(jnp.float32)

    partials = pl.pallas_call(
        _score_kernel,
        out_shape=jax.ShapeDtypeStruct((nt, 1, 128), jnp.float32),
        grid=(nt,),
        in_specs=[
            pl.BlockSpec((tb, dz), lambda i: (i, 0)),                # z tile
            pl.BlockSpec((tb, dx), lambda i: (i, 0)),                # x tile
            pl.BlockSpec((dz, dx), lambda i: (0, 0)),                # W (resident)
            pl.BlockSpec((1, dx), lambda i: (0, 0)),                 # b (resident)
            pl.BlockSpec((1, 1), lambda i: (0, 0),
                         memory_space=pltpu.SMEM),                   # inv_sigma2
        ],
        out_specs=pl.BlockSpec((1, 1, 128), lambda i: (i, 0, 0)),    # per-tile partial
        compiler_params=_compiler_params(),
        cost_estimate=pl.CostEstimate(
            flops=2 * bsz * dz * dx,
            transcendentals=0,
            bytes_accessed=4 * (bsz * dz + bsz * dx + dx + nt * 128) + 2 * dz * dx),
    )(z, x, w_bf16, b, inv_sigma2)

    # Data-independent normalization constants, hoisted out of the kernel.
    const = (-0.5 * bsz * dx * (_LOG_2PI + 2.0 * log_sigma)
             - 0.5 * bsz * dz * _LOG_2PI)
    return jnp.sum(partials[:, 0, 0]) + const


@functools.partial(jax.jit, static_argnames=("tb",))
def _sample_call(z, eps, w, b, log_sigma, *, tb):
    bsz, dz = z.shape
    dx = eps.shape[1]
    assert bsz % tb == 0, "batch must be divisible by the batch tile"
    nt = bsz // tb

    w_bf16 = w.astype(jnp.bfloat16)
    sigma = jnp.reshape(jnp.exp(log_sigma), (1, 1)).astype(jnp.float32)

    return pl.pallas_call(
        _sample_kernel,
        out_shape=jax.ShapeDtypeStruct((bsz, dx), jnp.float32),
        grid=(nt,),
        in_specs=[
            pl.BlockSpec((tb, dz), lambda i: (i, 0)),                # z tile
            pl.BlockSpec((tb, dx), lambda i: (i, 0)),                # eps tile
            pl.BlockSpec((dz, dx), lambda i: (0, 0)),                # W (resident)
            pl.BlockSpec((1, dx), lambda i: (0, 0)),                 # b (resident)
            pl.BlockSpec((1, 1), lambda i: (0, 0),
                         memory_space=pltpu.SMEM),                   # sigma
        ],
        out_specs=pl.BlockSpec((tb, dx), lambda i: (i, 0)),
        compiler_params=_compiler_params(),
        cost_estimate=pl.CostEstimate(
            flops=2 * bsz * dz * dx + 2 * bsz * dx,
            transcendentals=0,
            bytes_accessed=4 * (bsz * dz + 2 * bsz * dx + dx) + 2 * dz * dx),
    )(z, eps, w_bf16, b, sigma)


# --------------------------------------------------------------------------
# Module
# --------------------------------------------------------------------------
class SceneGenerativeProgram:
    """Concrete linear-Gaussian instantiation of the abstract interface.

    Samples from a distribution over environments described by latent
    variables z and observed variables x, dictated by parameters beta,
    and allows evaluation of p_beta(x, z).
    """

    def __init__(self, z_dim=32, x_dim=256, batch=16, batch_tile=8):
        self.z_dim = z_dim
        self.x_dim = x_dim
        self.batch = batch
        self.batch_tile = batch_tile
        # Deterministic parameter init (synthetic; not a checkpoint load).
        kw, kb = jax.random.split(jax.random.PRNGKey(42))
        self._params = {
            "W": (jax.random.normal(kw, (z_dim, x_dim), jnp.float32)
                  / jnp.sqrt(jnp.float32(z_dim))),
            "b": jax.random.normal(kb, (1, x_dim), jnp.float32) * 0.1,
            "log_sigma": jnp.float32(-0.5),
        }

    def get_default_param_dict(self):
        return dict(self._params)

    def forward(self, key, params=None):
        """Sample (x, z) from the generative process p_beta(x, z)."""
        p = self._params if params is None else params
        kz, kx = jax.random.split(key)
        z = jax.random.normal(kz, (self.batch, self.z_dim), jnp.float32)
        # TODO(synk): eps could be drawn in-kernel (pltpu.prng_seed +
        # pltpu.stateful_normal) to also drop the eps HBM read; kept in
        # jax.random here for exact JAX-key PRNG reproducibility.
        eps = jax.random.normal(kx, (self.batch, self.x_dim), jnp.float32)
        x = _sample_call(z, eps, p["W"], p["b"], p["log_sigma"],
                         tb=self.batch_tile)
        return x, z

    def score(self, x, z, params=None):
        """Evaluate log p_beta(x, z)."""
        p = self._params if params is None else params
        return _score_call(z, x, p["W"], p["b"], p["log_sigma"],
                           tb=self.batch_tile)


# --------------------------------------------------------------------------
# Pure-jnp references (match the kernel's bf16-operand / f32-accumulate matmul)
# --------------------------------------------------------------------------
def _reference_mean(z, w, b):
    return (jnp.dot(z.astype(jnp.bfloat16), w.astype(jnp.bfloat16),
                    preferred_element_type=jnp.float32) + b)


def _reference_score(z, x, w, b, log_sigma):
    mean = _reference_mean(z, w, b)
    sigma2 = jnp.exp(2.0 * log_sigma)
    bsz, dx = mean.shape
    dz = z.shape[1]
    logp_x = (-0.5 * jnp.sum((x - mean) ** 2) / sigma2
              - 0.5 * bsz * dx * (_LOG_2PI + 2.0 * log_sigma))
    logp_z = -0.5 * jnp.sum(z * z) - 0.5 * bsz * dz * _LOG_2PI
    return logp_x + logp_z


if __name__ == "__main__":
    BATCH, Z_DIM, X_DIM, TB = 16, 32, 256, 8     # grid = (2,): exercises tiling
    prog = SceneGenerativeProgram(z_dim=Z_DIM, x_dim=X_DIM,
                                  batch=BATCH, batch_tile=TB)
    key = jax.random.PRNGKey(0)

    # Forward pass: sample a scene (x, z) with the fused sampling kernel.
    x, z = prog.forward(key)
    x = jax.block_until_ready(x)
    z = jax.block_until_ready(z)

    # Score it with the tiled score kernel.
    score = jax.block_until_ready(prog.score(x, z))

    p = prog.get_default_param_dict()

    # Cross-check the sampling kernel: x should equal mean + sigma * eps.
    _, kx = jax.random.split(key)
    eps = jax.random.normal(kx, (BATCH, X_DIM), jnp.float32)
    x_ref = _reference_mean(z, p["W"], p["b"]) + jnp.exp(p["log_sigma"]) * eps
    assert jnp.allclose(x, x_ref, atol=2e-2), float(jnp.max(jnp.abs(x - x_ref)))

    # Cross-check the score kernel against the pure-jnp reference.
    ref = _reference_score(z, x, p["W"], p["b"], p["log_sigma"])
    assert jnp.allclose(score, ref, rtol=2e-4, atol=2.0), (float(score), float(ref))

    print("KERNEL_OK")
</pallas_src>

<mosaic_0001>
module attributes {stable_mosaic.version = 11 : i64} {
  func.func @_sample_kernel(%arg0: i32, %arg1: memref<8x32xf32, #tpu.memory_space<vmem>>, %arg2: memref<8x256xf32, #tpu.memory_space<vmem>>, %arg3: memref<32x256xbf16, #tpu.memory_space<vmem>>, %arg4: memref<1x256xf32, #tpu.memory_space<vmem>>, %arg5: memref<1x1xf32, #tpu.memory_space<smem>>, %arg6: memref<8x256xf32, #tpu.memory_space<vmem>>) attributes {dimension_semantics = [#tpu.dimension_semantics<parallel>], iteration_bounds = array<i64: 2>, scalar_prefetch = 0 : i64, scratch_operands = 0 : i64, tpu.core_type = #tpu.core_type<tc>, window_params = [{transform_indices = @transform_0, window_bounds = array<i64: 8, 32>}, {transform_indices = @transform_1, window_bounds = array<i64: 8, 256>}, {pipeline_mode = #tpu.pipeline_mode<synchronous>, transform_indices = @transform_2, window_bounds = array<i64: 32, 256>}, {pipeline_mode = #tpu.pipeline_mode<synchronous>, transform_indices = @transform_3, window_bounds = array<i64: 1, 256>}, {transform_indices = @transform_4, window_bounds = array<i64: 1, 1>}, {transform_indices = @transform_5, window_bounds = array<i64: 8, 256>}]} {
    %c0 = arith.constant 0 : index
    %c0_0 = arith.constant 0 : index
    %0 = vector.load %arg1[%c0, %c0_0] : memref<8x32xf32, #tpu.memory_space<vmem>>, vector<8x32xf32>
    %1 = arith.truncf %0 : vector<8x32xf32> to vector<8x32xbf16>
    %c0_1 = arith.constant 0 : index
    %c0_2 = arith.constant 0 : index
    %2 = vector.load %arg3[%c0_1, %c0_2] : memref<32x256xbf16, #tpu.memory_space<vmem>>, vector<32x256xbf16>
    %cst = arith.constant dense<0.000000e+00> : vector<8x256xf32>
    %3 = tpu.matmul %1, %2, %cst {dimension_numbers = #tpu.dot_dimension_numbers<[1], [0], [0], [1], [0, 0, 1, 1], [], []>} : vector<8x32xbf16>, vector<32x256xbf16>, vector<8x256xf32> -> vector<8x256xf32>
    %c0_3 = arith.constant 0 : index
    %c0_4 = arith.constant 0 : index
    %4 = vector.load %arg4[%c0_3, %c0_4] : memref<1x256xf32, #tpu.memory_space<vmem>>, vector<1x256xf32>
    %5 = vector.broadcast %4 : vector<1x256xf32> to vector<8x256xf32>
    %6 = arith.addf %3, %5 : vector<8x256xf32>
    %c0_5 = arith.constant 0 : index
    %c0_6 = arith.constant 0 : index
    %7 = memref.load %arg5[%c0_5, %c0_6] : memref<1x1xf32, #tpu.memory_space<smem>>
    %c0_7 = arith.constant 0 : index
    %c0_8 = arith.constant 0 : index
    %8 = vector.load %arg2[%c0_7, %c0_8] : memref<8x256xf32, #tpu.memory_space<vmem>>, vector<8x256xf32>
    %9 = vector.broadcast %7 : f32 to vector<8x256xf32>
    %10 = arith.mulf %9, %8 : vector<8x256xf32>
    %11 = arith.addf %6, %10 : vector<8x256xf32>
    %c0_9 = arith.constant 0 : index
    %c0_10 = arith.constant 0 : index
    %12 = vector.load %arg6[%c0_9, %c0_10] : memref<8x256xf32, #tpu.memory_space<vmem>>, vector<8x256xf32>
    tpu.vector_store %arg6[%c0_9, %c0_10], %11 {strides = array<i32>} : memref<8x256xf32, #tpu.memory_space<vmem>>, vector<8x256xf32>,
    return
  }
  func.func @transform_0(%arg0: i32) -> (i32, i32) {
    %c0_i32 = arith.constant 0 : i32
    %c0_i32_0 = arith.constant 0 : i32
    return %arg0, %c0_i32 : i32, i32
  }
  func.func @transform_1(%arg0: i32) -> (i32, i32) {
    %c0_i32 = arith.constant 0 : i32
    %c0_i32_0 = arith.constant 0 : i32
    return %arg0, %c0_i32 : i32, i32
  }
  func.func @transform_2(%arg0: i32) -> (i32, i32) {
    %c0_i32 = arith.constant 0 : i32
    %c0_i32_0 = arith.constant 0 : i32
    %c0_i32_1 = arith.constant 0 : i32
    return %c0_i32, %c0_i32_0 : i32, i32
  }
  func.func @transform_3(%arg0: i32) -> (i32, i32) {
    %c0_i32 = arith.constant 0 : i32
    %c0_i32_0 = arith.constant 0 : i32
    %c0_i32_1 = arith.constant 0 : i32
    return %c0_i32, %c0_i32_0 : i32, i32
  }
  func.func @transform_4(%arg0: i32) -> (i32, i32) {
    %c0_i32 = arith.constant 0 : i32
    %c0_i32_0 = arith.constant 0 : i32
    %c0_i32_1 = arith.constant 0 : i32
    return %c0_i32, %c0_i32_0 : i32, i32
  }
  func.func @transform_5(%arg0: i32) -> (i32, i32) {
    %c0_i32 = arith.constant 0 : i32
    %c0_i32_0 = arith.constant 0 : i32
    return %arg0, %c0_i32 : i32, i32
  }
}

</mosaic_0001>

<bundles_post_ra>
// kernel: _sample_call.1
= control target key start
LH: loop header
LB: loop body
LE: loop exit
PB: predicated region body
PF: predicated region fallthrough
CT: control target
= control target key end

     0   :  { %s704_s0 = inlined_call_operand.vmem [shape: f32[16,32], index: 0, kind: input, shape index: {}]   ;;  %s705_s1 = inlined_call_operand.vmem [shape: f32[16,256], index: 1, kind: input, shape index: {}]   ;;  %s706_s2 = inlined_call_operand.vmem [shape: bf16[32,256], index: 2, kind: input, shape index: {}]   ;;  %s707_s3 = inlined_call_operand.vmem [shape: f32[1,256], index: 3, kind: input, shape index: {}]   ;;  %s708_s4 = inlined_call_operand.<no memory space> [shape: f32[1,1], index: 4, kind: input, shape index: {}]   ;;  %s709_s5 = inlined_call_operand.hbm [shape: f32[16,256], index: 5, kind: output, shape index: {}]  }
   0x1   :  { %10 = sst [smem:[#allocation2]] %s708_s4 }
   0x2   :  { %11 = vsyncpa [#allocation4], 0 }
   0x3   :  { %13 = vsyncpa [#allocation4 + $0x1], 0  ;;  %s586_s20 = smov 0   ;;  %s588_s21 = smov 0  }
   0x4   :  { %s590_s22 = smov 0   ;;  %s592_s23 = smov 0  }
   0x5 LB: > { %s607_s4 = sadd.s32 4294967295, %s549_s23   ;;  %s421_s24 = sadd.s32 4294967294, %s549_s23   ;;  %s549_s23 = sphi %s592_s23, %s715_s23   ;;  %s545_s22 = sphi %s590_s22, %s714_s22   ;;  %s541_s21 = sphi %s588_s21, %s713_s21   ;;  %s537_s20 = sphi %s586_s20, %s712_s20  }
   0x6   : > { %s611_s25 = sadd.s32 1, %s549_s23   ;;  %s141_s26 = sadd.s32 1, %s545_s22 }
   0x7   : > { %s138_s27 = ssub.s32 %s549_s23, %s611_s25  ;;  %p151_p0 = scmp.ne.s32.totalorder %s545_s22, %s541_s21 }
   0x8   : > { %p139_p1 = scmp.eq.s32.totalorder %s138_s27, 0  ;;  %p152_p2 = scmp.eq.s32.totalorder %s607_s4, 1 }
   0x9   : > { %p157_p3 = scmp.ne.s32.totalorder %s541_s21, %s537_s20  ;;  %p158_p4 = scmp.eq.s32.totalorder %s421_s24, 1 }
   0xa   : > { %s622_s28 = scalar_select %p139_p1, %s545_s22, %s141_s26  }
   0xb   : > { %p624_p5 = por %p152_p2, %p151_p0  ;;  %p628_p6 = por %p158_p4, %p157_p3 }
   0xc   : > { %p424_p7 = scmp.ge.s32.totalorder %s549_s23, 1  ;;  %p200_p8 = scmp.lt.s32.totalorder %s549_s23, 3 }
   0xe   : > { %p201_p9 = pnand %p424_p7, %p200_p8 }
   0xf   : > { %v481_v0 = vld [vmem:[%s706_s2 + $0x4] ss:$8 sps:$4 sm:$0xff] (!%p201_p9)   ;;  %p232_p10 = scmp.lt.s32.totalorder (!%p201_p9), %s607_s4, 1  ;;  %v483_v1 = vld [vmem:[%s706_s2] ss:$8 sps:$4 sm:$0xff] (!%p201_p9)   ;;  %v551_v2 = vmov (!%p201_p9), 0   ;;  %v250_v7 = vlaneseq (!%p201_p9) }
  0x10   : > { %204 = sbr.rel (%p201_p9) target bundleno = 261 (0x105), region = 40  ;;  %316 = vmatprep.mubr.bf16.mxu0 (!%p201_p9), %v551_v2  ;;  %284 = vmatprep.subr.bf16.mxu0 (!%p201_p9), %v481_v0  ;;  %v484_v3 = vld [vmem:[%s706_s2 + $0x14] ss:$8 sps:$4 sm:$0xff] (!%p201_p9)   ;;  %v486_v4 = vld [vmem:[%s706_s2 + $0x10] ss:$8 sps:$4 sm:$0xff] (!%p201_p9)   ;;  %vm280_vm0 = vcmask (!%p201_p9), 261120  }
  0x11   : > { %285 = vmatpush1.bf16.msra.mxu0 (!%p201_p9), %v483_v1  ;;  %s325_s19 = sld [smem:[#allocation2]] (!%p201_p9)  ;;  %v251_v8 = vshrl.u32 (!%p201_p9), %v250_v7, 7  ;;  %s229_s26 = sand.u32 (!%p201_p9), 1, %s541_s21   ;;  %v248_v10 = vld [vmem:[%s707_s3] sm:$0x3] (!%p201_p9) }
  0x12   : > { %286 = vmatprep.subr.bf16.mxu0 (!%p201_p9), %v484_v3  ;;  %s425_s10 = sshll.u32 (!%p201_p9), %s229_s26, 4  ;;  %s440_s11 = sshll.u32 (!%p201_p9), %s607_s4, 8 }
  0x13   : > { %v252_v9 = vsub.s32 (!%p201_p9), 0, %v251_v8  ;;  %v256_v11 = vsub.s32 (!%p201_p9), 1, %v251_v8  ;;  %s662_s16 = scalar_lea.hbm (!%p201_p9), %s709_s5, %s440_s11 }
  0x15   : > { %287 = vmatpush1.bf16.msra.mxu0 (!%p201_p9), %v486_v4  ;;  %v253_v14 = vrot.slane (!%p201_p9), %v248_v10, %v252_v9  ;;  %v257_v16 = vrot.slane (!%p201_p9), %v248_v10, %v256_v11 }
  0x17   : > { %s233_s12 = scalar_select %p232_p10, %s607_s4, 1  ;;  %v328_v13 = vstv %s325_s19 }
  0x18   : > { %s336_s4 = scalar_lea.sflag [#allocation4], %s229_s26 }
  0x19   : > { %s426_s15 = sshll.u32 %s233_s12, 3  ;;  %s439_s24 = sshll.u32 %s233_s12, 4 }
  0x1a   : > { %s235_s18 = scalar_lea.vmem %s704_s0, %s426_s15  ;;  %s240_s7 = scalar_lea.vmem %s705_s1, %s439_s24 }
  0x1b   : > { %v242_v5 = vld [vmem:[%s235_s18] sm:$0xff]  ;;  %v327_v15 = vld [vmem:[%s240_s7 + $0x8] sm:$0xff]  ;;  %s231_s12 = scalar_lea.vmem [#allocation3], %s425_s10  ;;  %s552_s18 = smov [#allocation3]  }
  0x1c   : > { %v243_v6 = vpack.c.bf16 %v242_v5, %v242_v5  ;;  %v326_v12 = vld [vmem:[%s240_s7] sm:$0xff]  ;;  %v330_v19 = vmul.f32 %v328_v13, %v327_v15  ;;  %s350_s13 = sshll.u32 %s231_s12, 4  ;;  %s491_s19 = sshll.u32 %s552_s18, 4  ;;  %s664_s13 = int_to_ptr.vmem [resolvable:$true] %s350_s13  ;;  %s492_s19 = int_to_ptr.vmem [resolvable:$false] %s491_s19 }
  0x1d   : > { %v329_v17 = vmul.f32 %v328_v13, %v326_v12  ;;  %s487_s17 = scalar_lea.vmem %s664_s13, 256  ;;  %s493_s24 = scalar_lea.vmem %s492_s19, 512 }
  0x1e   : > { %433 = vmatmul.mubr.msk.bf16.vlgmr.msra.gmra.mrb[0].mxu0 %vm280_vm0, %v243_v6  ;;  %p488_p11 = scmp.ne.s32.totalorder %s664_s13, %s487_s17  ;;  %p494_p0 = scmp.lt.s32.totalorder %s664_s13, %s492_s19 }
  0x1f   : > { %p495_p1 = scmp.lt.s32.totalorder %s493_s24, %s487_s17 }
  0x20   : > { %p489_p12 = pnand %p488_p11, %p624_p5 }
  0x21   : > { %p496_p2 = por %p495_p1, %p494_p0 }
  0x22   : > { %p490_p13 = pneg %p489_p12 }
  0x24   : > { %p497_p3 = pnand %p496_p2, %p490_p13 }
  0xf1   : > { %v318_v18 = vpop.f32.mrb[0].mxu0 }
  0xf2   : > { %v319_v20 = vadd.f32 %v318_v18, %v253_v14  ;;  %v320_v21 = vpop.f32.mrb[1].mxu0 }
  0xf3   : > { %v321_v22 = vadd.f32 %v320_v21, %v257_v16  ;;  %v322_v23 = vpop.f32.mrb[2].mxu0 }
  0xf4   : > { %v331_v24 = vadd.f32 %v329_v17, %v319_v20  ;;  %v323_v25 = vpop.f32.mrb[3].mxu0 }
  0xf5   : > { %v332_v26 = vadd.f32 %v330_v19, %v321_v22 }
  0xf6   : > { %333 = vst [vmem:[%s231_s12] sm:$0xff] %v331_v24 }
  0xf7   : > { %334 = vst [vmem:[%s231_s12 + $0x8] sm:$0xff] %v332_v26 }
  0xf8   : > { %500 = shalt.err (!%p497_p3)
}
  0xf9   : > { %s501_s26 = scalar_lea.hbm %s662_s16, 256  ;;  %s505_s7 = scalar_lea.hbm %s709_s5, 512 }
  0xfa   : > { %p502_p4 = scmp.ne.s32.totalorder %s662_s16, %s501_s26  ;;  %p506_p9 = scmp.lt.u32.totalorder %s662_s16, %s709_s5 }
  0xfb   : > { %p507_p10 = scmp.lt.u32.totalorder %s505_s7, %s501_s26  ;;  %p509_p12 = scmp.lt.u32.totalorder %s501_s26, %s662_s16 }
  0xfc   : > { %p503_p7 = pnand %p502_p4, %p624_p5 }
  0xfd   : > { %p508_p11 = por %p507_p10, %p506_p9 }
  0xfe   : > { %p504_p8 = pneg %p503_p7 }
  0xff   : > { %p510_p13 = por %p509_p12, %p508_p11 }
 0x101   : > { %p511_p0 = pnand %p510_p13, %p504_p8 }
 0x103   : > { %514 = shalt.err (!%p511_p0)
}
 0x104   : > { %441 = dma.vmem_to_hbm [thread:$0]  (%p624_p5), %s664_s13, 256, %s662_s16, %s336_s4  }
 0x105 PF: > { %p447_p1 = scmp.ge.s32.totalorder %s549_s23, 2  ;;  %s362_s10 = sand.u32 1, %s537_s20  }
 0x106   : > { %s363_s11 = scalar_lea.sflag [#allocation4], %s362_s10 }
 0x107   : > { %p444_p2 = pnand %p447_p1, %p628_p6 }
 0x109   : > { %532 = dma.done.wait (!%p444_p2), %s363_s11, 256  }
 0x10a   : > { %534 = vsyncadd (!%p444_p2), %s363_s11, 4294967040  ;;  %p16_p3 = scmp.ge.s32.totalorder %s611_s25, 4   ;;  %s712_s20 = smov %s541_s21 }
 0x10b   : > { %s713_s21 = smov %s545_s22  ;;  %s714_s22 = smov %s622_s28 }
 0x10c   : > { %s715_s23 = smov %s611_s25  ;;  %18 = sbr.rel (!%p16_p3) target bundleno = 5 (0x5), region = 78 }
 0x113   :  { %368 = vsyncpa [#allocation4], 1 }
 0x114   :  { %370 = vsyncpa [#allocation4 + $0x1], 1 }

</bundles_post_ra>
